<compile_context>
chip_gen: v7x
topology: tpu7x:2x2x1
jax: 0.10.0
libtpu: 0.0.40
codegen_flags: <defaults>
</compile_context>

<pallas_src>
import numpy as np
import jax
import jax.numpy as jnp
from jax.experimental import pallas as pl
from jax.experimental.pallas import tpu as pltpu

LANE = 128
SUBLANE = 8


def _round_up(x, m):
    return (x + m - 1) // m * m


def _make_vae_kernel(n_enc: int, n_dec: int, dp: int):
    """Build the VAE forward kernel for a fixed layer count and padded width dp.

    Packed layer order (first axis of w_ref / b_ref):
        fc_in, [enc_0..enc_{n_enc-1}], fc_latin1, fc_latin2, fc_latout,
        [dec_0..dec_{n_dec-1}], fc_out
    """

    def kernel(xe_ref, w_ref, b_ref, out_ref):
        # xe_ref:  (TB, 2*dp)           [padded input | padded eps] slab
        # w_ref:   (n_layers, dp, dp)   packed, pre-transposed, zero-padded weights
        # b_ref:   (n_layers_pad, dp)   packed, zero-padded bias rows
        # out_ref: (TB, 3*dp)           [recon | mu | logvar] slab

        def lin(i, h):
            w = w_ref[i]                  # (dp, dp), static-index slice
            b = b_ref[i:i + 1, :]         # (1, dp), broadcasts over batch
            return jnp.dot(h, w, preferred_element_type=jnp.float32) + b

        x = xe_ref[:, 0 * dp:1 * dp]
        eps = xe_ref[:, 1 * dp:2 * dp]

        # ---------------- encode ----------------
        h = jnp.maximum(lin(0, x), 0.0)                   # fc_in + ReLU
        # TODO(synk): F.dropout / nn.Dropout omitted (inference mode, identity).
        idx = 1
        for _ in range(n_enc):                            # fc_enc blocks
            h = jnp.maximum(lin(idx, h), 0.0)
            idx += 1
        mu = lin(idx, h); idx += 1                        # fc_latin1
        logvar = lin(idx, h); idx += 1                    # fc_latin2

        # ------------- reparameterize ------------
        std = jnp.exp(0.5 * logvar)
        z = eps * std + mu

        # ---------------- decode ----------------
        h = jnp.maximum(lin(idx, z), 0.0); idx += 1       # fc_latout + ReLU
        for _ in range(n_dec):                            # fc_dec blocks
            h = jnp.maximum(lin(idx, h), 0.0)
            idx += 1
        recon = lin(idx, h)                               # fc_out

        # single lane-dense output slab (all slices are 128-lane aligned)
        out_ref[:, 0 * dp:1 * dp] = recon
        out_ref[:, 1 * dp:2 * dp] = mu
        out_ref[:, 2 * dp:3 * dp] = logvar

    return kernel


def init_vae_params(key, input_dim, hidden_dims, latent_dim):
    """Deterministic PyTorch-style U(-1/sqrt(fan_in), 1/sqrt(fan_in)) init.

    Returns a flat list of (W_transposed, b_row) in kernel layer order, unpadded.
    """
    def linear(k, fan_in, fan_out):
        kw, kb = jax.random.split(k)
        bound = 1.0 / float(fan_in) ** 0.5
        w = jax.random.uniform(kw, (fan_in, fan_out), jnp.float32, -bound, bound)
        b = jax.random.uniform(kb, (1, fan_out), jnp.float32, -bound, bound)
        return w, b

    shapes = []
    shapes.append((input_dim, hidden_dims[0]))                       # fc_in
    for i in range(len(hidden_dims) - 1):                            # fc_enc
        shapes.append((hidden_dims[i], hidden_dims[i + 1]))
    shapes.append((hidden_dims[-1], latent_dim))                     # fc_latin1
    shapes.append((hidden_dims[-1], latent_dim))                     # fc_latin2
    shapes.append((latent_dim, hidden_dims[-1]))                     # fc_latout
    for i in reversed(range(len(hidden_dims) - 1)):                  # fc_dec
        shapes.append((hidden_dims[i + 1], hidden_dims[i]))
    shapes.append((hidden_dims[0], input_dim))                       # fc_out

    keys = jax.random.split(key, len(shapes))
    return [linear(k, fi, fo) for k, (fi, fo) in zip(keys, shapes)]


def _pack_params(params, dp):
    """Pack all (W, b) into one zero-padded weight slab and one bias slab."""
    n = len(params)
    n_b = _round_up(n, SUBLANE)
    w_packed = np.zeros((n, dp, dp), np.float32)
    b_packed = np.zeros((n_b, dp), np.float32)
    for i, (w, b) in enumerate(params):
        w = np.asarray(w, np.float32)
        b = np.asarray(b, np.float32).reshape(-1)
        w_packed[i, : w.shape[0], : w.shape[1]] = w
        b_packed[i, : b.shape[0]] = b
    return jnp.asarray(w_packed), jnp.asarray(b_packed)


def vae_forward(x, eps, params, input_dim, hidden_dims, latent_dim,
                block_batch=None):
    """Run the Pallas VAE forward kernel. Returns (recon, mu, logvar)."""
    B = x.shape[0]
    n_enc = n_dec = len(hidden_dims) - 1
    dp = _round_up(max([input_dim, latent_dim] + list(hidden_dims)), LANE)

    # Batch tile: multiple of 8 sublanes; cap so activations + resident weights
    # stay far under the (v7x-smallest) 32 MiB scoped-VMEM default.
    if block_batch is None:
        block_batch = min(256, _round_up(B, SUBLANE))
    tb = _round_up(block_batch, SUBLANE)
    b_pad = _round_up(max(B, tb), tb)
    nb = b_pad // tb

    # Lane-dense padded [x | eps] slab (single per-step activation DMA).
    xp = jnp.pad(x.astype(jnp.float32), ((0, b_pad - B), (0, dp - input_dim)))
    ep = jnp.pad(eps.astype(jnp.float32), ((0, b_pad - B), (0, dp - latent_dim)))
    xe = jnp.concatenate([xp, ep], axis=1)                     # (b_pad, 2*dp)

    w_packed, b_packed = _pack_params(params, dp)
    n_layers = w_packed.shape[0]
    n_layers_b = b_packed.shape[0]

    kernel = _make_vae_kernel(n_enc, n_dec, dp)

    flops = 2 * b_pad * sum(int(w.shape[0]) * int(w.shape[1]) for w, _ in params)
    bytes_accessed = 4 * (xe.size + w_packed.size + b_packed.size
                          + b_pad * 3 * dp)
    cost = pl.CostEstimate(flops=flops,
                           transcendentals=b_pad * latent_dim,
                           bytes_accessed=bytes_accessed)

    out = pl.pallas_call(
        kernel,
        out_shape=jax.ShapeDtypeStruct((b_pad, 3 * dp), jnp.float32),
        grid_spec=pltpu.PrefetchScalarGridSpec(
            num_scalar_prefetch=0,
            grid=(nb,),
            in_specs=[
                pl.BlockSpec((tb, 2 * dp), lambda i: (i, 0)),                # x|eps
                pl.BlockSpec((n_layers, dp, dp), lambda i: (0, 0, 0)),       # W slab
                pl.BlockSpec((n_layers_b, dp), lambda i: (0, 0)),            # b slab
            ],
            out_specs=pl.BlockSpec((tb, 3 * dp), lambda i: (i, 0)),
        ),
        compiler_params=pltpu.CompilerParams(
            dimension_semantics=("parallel",),
        ),
        cost_estimate=cost,
    )(xe, w_packed, b_packed)

    recon = out[:B, :input_dim]
    mu = out[:B, dp:dp + latent_dim]
    logvar = out[:B, 2 * dp:2 * dp + latent_dim]
    return recon, mu, logvar


def vae_forward_ref(x, eps, params, hidden_dims):
    """Pure-JAX reference for correctness checking."""
    n_enc = len(hidden_dims) - 1

    def lin(i, h):
        w, b = params[i]
        return h @ w + b

    h = jnp.maximum(lin(0, x), 0.0)
    idx = 1
    for _ in range(n_enc):
        h = jnp.maximum(lin(idx, h), 0.0)
        idx += 1
    mu = lin(idx, h); idx += 1
    logvar = lin(idx, h); idx += 1
    z = eps * jnp.exp(0.5 * logvar) + mu
    h = jnp.maximum(lin(idx, z), 0.0); idx += 1
    for _ in range(n_enc):
        h = jnp.maximum(lin(idx, h), 0.0)
        idx += 1
    return lin(idx, h), mu, logvar


if __name__ == "__main__":
    # Small, forward-consistent config: VAE(input_dim=16, hidden_dims=[32, 32],
    # latent_dim=8, ps=[0.0, 0.0]) applied to a batch of 8 vectors.
    input_dim, hidden_dims, latent_dim = 16, [32, 32], 8
    batch = 8

    key = jax.random.PRNGKey(0)
    k_x, k_eps, k_params = jax.random.split(key, 3)

    x = jax.random.normal(k_x, (batch, input_dim), dtype=jnp.float32)
    eps = jax.random.normal(k_eps, (batch, latent_dim), dtype=jnp.float32)
    params = init_vae_params(k_params, input_dim, hidden_dims, latent_dim)

    recon, mu, logvar = vae_forward(x, eps, params,
                                    input_dim, hidden_dims, latent_dim)
    jax.block_until_ready((recon, mu, logvar))

    recon_r, mu_r, logvar_r = vae_forward_ref(x, eps, params, hidden_dims)
    assert recon.shape == (batch, input_dim)
    assert mu.shape == (batch, latent_dim) and logvar.shape == (batch, latent_dim)
    # Tolerance covers possible MXU default-precision (bf16-pass) rounding
    # differences between the kernel and the XLA reference matmuls.
    assert jnp.allclose(recon, recon_r, atol=1e-4, rtol=1e-4)
    assert jnp.allclose(mu, mu_r, atol=1e-4, rtol=1e-4)
    assert jnp.allclose(logvar, logvar_r, atol=1e-4, rtol=1e-4)

    print("KERNEL_OK")
</pallas_src>

<mosaic_0001>
module attributes {stable_mosaic.version = 11 : i64} {
  func.func @kernel(%arg0: i32, %arg1: memref<8x256xf32, #tpu.memory_space<vmem>>, %arg2: memref<7x128x128xf32, #tpu.memory_space<vmem>>, %arg3: memref<8x128xf32, #tpu.memory_space<vmem>>, %arg4: memref<8x384xf32, #tpu.memory_space<vmem>>) attributes {dimension_semantics = [#tpu.dimension_semantics<parallel>], iteration_bounds = array<i64: 1>, scalar_prefetch = 0 : i64, scratch_operands = 0 : i64, tpu.core_type = #tpu.core_type<tc>, window_params = [{transform_indices = @transform_0, window_bounds = array<i64: 8, 256>}, {pipeline_mode = #tpu.pipeline_mode<synchronous>, transform_indices = @transform_1, window_bounds = array<i64: 7, 128, 128>}, {pipeline_mode = #tpu.pipeline_mode<synchronous>, transform_indices = @transform_2, window_bounds = array<i64: 8, 128>}, {transform_indices = @transform_3, window_bounds = array<i64: 8, 384>}]} {
    %c0 = arith.constant 0 : index
    %c0_0 = arith.constant 0 : index
    %0 = vector.load %arg1[%c0, %c0_0] : memref<8x256xf32, #tpu.memory_space<vmem>>, vector<8x128xf32>
    %c0_1 = arith.constant 0 : index
    %c128 = arith.constant 128 : index
    %1 = vector.load %arg1[%c0_1, %c128] : memref<8x256xf32, #tpu.memory_space<vmem>>, vector<8x128xf32>
    %c0_2 = arith.constant 0 : index
    %c0_3 = arith.constant 0 : index
    %c0_4 = arith.constant 0 : index
    %2 = vector.load %arg2[%c0_2, %c0_3, %c0_4] : memref<7x128x128xf32, #tpu.memory_space<vmem>>, vector<1x128x128xf32>
    %3 = vector.shape_cast %2 : vector<1x128x128xf32> to vector<128x128xf32>
    %c0_5 = arith.constant 0 : index
    %c0_6 = arith.constant 0 : index
    %4 = vector.load %arg3[%c0_5, %c0_6] : memref<8x128xf32, #tpu.memory_space<vmem>>, vector<1x128xf32>
    %cst = arith.constant dense<0.000000e+00> : vector<8x128xf32>
    %5 = tpu.matmul %0, %3, %cst {dimension_numbers = #tpu.dot_dimension_numbers<[1], [0], [0], [1], [0, 0, 1, 1], [], []>} : vector<8x128xf32>, vector<128x128xf32>, vector<8x128xf32> -> vector<8x128xf32>
    %6 = vector.broadcast %4 : vector<1x128xf32> to vector<8x128xf32>
    %7 = arith.addf %5, %6 : vector<8x128xf32>
    %cst_7 = arith.constant 0.000000e+00 : f32
    %8 = vector.broadcast %cst_7 : f32 to vector<8x128xf32>
    %9 = arith.maximumf %7, %8 : vector<8x128xf32>
    %c1 = arith.constant 1 : index
    %c0_8 = arith.constant 0 : index
    %c0_9 = arith.constant 0 : index
    %10 = vector.load %arg2[%c1, %c0_8, %c0_9] : memref<7x128x128xf32, #tpu.memory_space<vmem>>, vector<1x128x128xf32>
    %11 = vector.shape_cast %10 : vector<1x128x128xf32> to vector<128x128xf32>
    %c1_10 = arith.constant 1 : index
    %c0_11 = arith.constant 0 : index
    %12 = vector.load %arg3[%c1_10, %c0_11] : memref<8x128xf32, #tpu.memory_space<vmem>>, vector<1x128xf32>
    %cst_12 = arith.constant dense<0.000000e+00> : vector<8x128xf32>
    %13 = tpu.matmul %9, %11, %cst_12 {dimension_numbers = #tpu.dot_dimension_numbers<[1], [0], [0], [1], [0, 0, 1, 1], [], []>} : vector<8x128xf32>, vector<128x128xf32>, vector<8x128xf32> -> vector<8x128xf32>
    %14 = vector.broadcast %12 : vector<1x128xf32> to vector<8x128xf32>
    %15 = arith.addf %13, %14 : vector<8x128xf32>
    %cst_13 = arith.constant 0.000000e+00 : f32
    %16 = vector.broadcast %cst_13 : f32 to vector<8x128xf32>
    %17 = arith.maximumf %15, %16 : vector<8x128xf32>
    %c2 = arith.constant 2 : index
    %c0_14 = arith.constant 0 : index
    %c0_15 = arith.constant 0 : index
    %18 = vector.load %arg2[%c2, %c0_14, %c0_15] : memref<7x128x128xf32, #tpu.memory_space<vmem>>, vector<1x128x128xf32>
    %19 = vector.shape_cast %18 : vector<1x128x128xf32> to vector<128x128xf32>
    %c2_16 = arith.constant 2 : index
    %c0_17 = arith.constant 0 : index
    %20 = vector.load %arg3[%c2_16, %c0_17] : memref<8x128xf32, #tpu.memory_space<vmem>>, vector<1x128xf32>
    %cst_18 = arith.constant dense<0.000000e+00> : vector<8x128xf32>
    %21 = tpu.matmul %17, %19, %cst_18 {dimension_numbers = #tpu.dot_dimension_numbers<[1], [0], [0], [1], [0, 0, 1, 1], [], []>} : vector<8x128xf32>, vector<128x128xf32>, vector<8x128xf32> -> vector<8x128xf32>
    %22 = vector.broadcast %20 : vector<1x128xf32> to vector<8x128xf32>
    %23 = arith.addf %21, %22 : vector<8x128xf32>
    %c3 = arith.constant 3 : index
    %c0_19 = arith.constant 0 : index
    %c0_20 = arith.constant 0 : index
    %24 = vector.load %arg2[%c3, %c0_19, %c0_20] : memref<7x128x128xf32, #tpu.memory_space<vmem>>, vector<1x128x128xf32>
    %25 = vector.shape_cast %24 : vector<1x128x128xf32> to vector<128x128xf32>
    %c3_21 = arith.constant 3 : index
    %c0_22 = arith.constant 0 : index
    %26 = vector.load %arg3[%c3_21, %c0_22] : memref<8x128xf32, #tpu.memory_space<vmem>>, vector<1x128xf32>
    %cst_23 = arith.constant dense<0.000000e+00> : vector<8x128xf32>
    %27 = tpu.matmul %17, %25, %cst_23 {dimension_numbers = #tpu.dot_dimension_numbers<[1], [0], [0], [1], [0, 0, 1, 1], [], []>} : vector<8x128xf32>, vector<128x128xf32>, vector<8x128xf32> -> vector<8x128xf32>
    %28 = vector.broadcast %26 : vector<1x128xf32> to vector<8x128xf32>
    %29 = arith.addf %27, %28 : vector<8x128xf32>
    %cst_24 = arith.constant 5.000000e-01 : f32
    %30 = vector.broadcast %cst_24 : f32 to vector<8x128xf32>
    %31 = arith.mulf %30, %29 : vector<8x128xf32>
    %32 = math.exp %31 : vector<8x128xf32>
    %33 = arith.mulf %1, %32 : vector<8x128xf32>
    %34 = arith.addf %33, %23 : vector<8x128xf32>
    %c4 = arith.constant 4 : index
    %c0_25 = arith.constant 0 : index
    %c0_26 = arith.constant 0 : index
    %35 = vector.load %arg2[%c4, %c0_25, %c0_26] : memref<7x128x128xf32, #tpu.memory_space<vmem>>, vector<1x128x128xf32>
    %36 = vector.shape_cast %35 : vector<1x128x128xf32> to vector<128x128xf32>
    %c4_27 = arith.constant 4 : index
    %c0_28 = arith.constant 0 : index
    %37 = vector.load %arg3[%c4_27, %c0_28] : memref<8x128xf32, #tpu.memory_space<vmem>>, vector<1x128xf32>
    %cst_29 = arith.constant dense<0.000000e+00> : vector<8x128xf32>
    %38 = tpu.matmul %34, %36, %cst_29 {dimension_numbers = #tpu.dot_dimension_numbers<[1], [0], [0], [1], [0, 0, 1, 1], [], []>} : vector<8x128xf32>, vector<128x128xf32>, vector<8x128xf32> -> vector<8x128xf32>
    %39 = vector.broadcast %37 : vector<1x128xf32> to vector<8x128xf32>
    %40 = arith.addf %38, %39 : vector<8x128xf32>
    %cst_30 = arith.constant 0.000000e+00 : f32
    %41 = vector.broadcast %cst_30 : f32 to vector<8x128xf32>
    %42 = arith.maximumf %40, %41 : vector<8x128xf32>
    %c5 = arith.constant 5 : index
    %c0_31 = arith.constant 0 : index
    %c0_32 = arith.constant 0 : index
    %43 = vector.load %arg2[%c5, %c0_31, %c0_32] : memref<7x128x128xf32, #tpu.memory_space<vmem>>, vector<1x128x128xf32>
    %44 = vector.shape_cast %43 : vector<1x128x128xf32> to vector<128x128xf32>
    %c5_33 = arith.constant 5 : index
    %c0_34 = arith.constant 0 : index
    %45 = vector.load %arg3[%c5_33, %c0_34] : memref<8x128xf32, #tpu.memory_space<vmem>>, vector<1x128xf32>
    %cst_35 = arith.constant dense<0.000000e+00> : vector<8x128xf32>
    %46 = tpu.matmul %42, %44, %cst_35 {dimension_numbers = #tpu.dot_dimension_numbers<[1], [0], [0], [1], [0, 0, 1, 1], [], []>} : vector<8x128xf32>, vector<128x128xf32>, vector<8x128xf32> -> vector<8x128xf32>
    %47 = vector.broadcast %45 : vector<1x128xf32> to vector<8x128xf32>
    %48 = arith.addf %46, %47 : vector<8x128xf32>
    %cst_36 = arith.constant 0.000000e+00 : f32
    %49 = vector.broadcast %cst_36 : f32 to vector<8x128xf32>
    %50 = arith.maximumf %48, %49 : vector<8x128xf32>
    %c6 = arith.constant 6 : index
    %c0_37 = arith.constant 0 : index
    %c0_38 = arith.constant 0 : index
    %51 = vector.load %arg2[%c6, %c0_37, %c0_38] : memref<7x128x128xf32, #tpu.memory_space<vmem>>, vector<1x128x128xf32>
    %52 = vector.shape_cast %51 : vector<1x128x128xf32> to vector<128x128xf32>
    %c6_39 = arith.constant 6 : index
    %c0_40 = arith.constant 0 : index
    %53 = vector.load %arg3[%c6_39, %c0_40] : memref<8x128xf32, #tpu.memory_space<vmem>>, vector<1x128xf32>
    %cst_41 = arith.constant dense<0.000000e+00> : vector<8x128xf32>
    %54 = tpu.matmul %50, %52, %cst_41 {dimension_numbers = #tpu.dot_dimension_numbers<[1], [0], [0], [1], [0, 0, 1, 1], [], []>} : vector<8x128xf32>, vector<128x128xf32>, vector<8x128xf32> -> vector<8x128xf32>
    %55 = vector.broadcast %53 : vector<1x128xf32> to vector<8x128xf32>
    %56 = arith.addf %54, %55 : vector<8x128xf32>
    %c0_42 = arith.constant 0 : index
    %c0_43 = arith.constant 0 : index
    %57 = vector.load %arg4[%c0_42, %c0_43] : memref<8x384xf32, #tpu.memory_space<vmem>>, vector<8x128xf32>
    tpu.vector_store %arg4[%c0_42, %c0_43], %56 {strides = array<i32>} : memref<8x384xf32, #tpu.memory_space<vmem>>, vector<8x128xf32>,
    %c0_44 = arith.constant 0 : index
    %c128_45 = arith.constant 128 : index
    %58 = vector.load %arg4[%c0_44, %c128_45] : memref<8x384xf32, #tpu.memory_space<vmem>>, vector<8x128xf32>
    tpu.vector_store %arg4[%c0_44, %c128_45], %23 {strides = array<i32>} : memref<8x384xf32, #tpu.memory_space<vmem>>, vector<8x128xf32>,
    %c0_46 = arith.constant 0 : index
    %c256 = arith.constant 256 : index
    %59 = vector.load %arg4[%c0_46, %c256] : memref<8x384xf32, #tpu.memory_space<vmem>>, vector<8x128xf32>
    tpu.vector_store %arg4[%c0_46, %c256], %29 {strides = array<i32>} : memref<8x384xf32, #tpu.memory_space<vmem>>, vector<8x128xf32>,
    return
  }
  func.func @transform_0(%arg0: i32) -> (i32, i32) {
    %c0_i32 = arith.constant 0 : i32
    %c0_i32_0 = arith.constant 0 : i32
    return %arg0, %c0_i32 : i32, i32
  }
  func.func @transform_1(%arg0: i32) -> (i32, i32, i32) {
    %c0_i32 = arith.constant 0 : i32
    %c0_i32_0 = arith.constant 0 : i32
    %c0_i32_1 = arith.constant 0 : i32
    %c0_i32_2 = arith.constant 0 : i32
    return %c0_i32, %c0_i32_0, %c0_i32_1 : i32, i32, i32
  }
  func.func @transform_2(%arg0: i32) -> (i32, i32) {
    %c0_i32 = arith.constant 0 : i32
    %c0_i32_0 = arith.constant 0 : i32
    %c0_i32_1 = arith.constant 0 : i32
    return %c0_i32, %c0_i32_0 : i32, i32
  }
  func.func @transform_3(%arg0: i32) -> (i32, i32) {
    %c0_i32 = arith.constant 0 : i32
    %c0_i32_0 = arith.constant 0 : i32
    return %arg0, %c0_i32 : i32, i32
  }
}

</mosaic_0001>

<bundles_post_ra>
// kernel: tpu_custom_call.1
= control target key start
LH: loop header
LB: loop body
LE: loop exit
PB: predicated region body
PF: predicated region fallthrough
CT: control target
= control target key end

     0   :  { %8 = vsyncpa [#allocation3], 0  ;;  %s1516_s0 = inlined_call_operand.hbm [shape: f32[8,256], index: 0, kind: input, shape index: {}]   ;;  %s1517_s1 = inlined_call_operand.hbm [shape: f32[7,128,128], index: 1, kind: input, shape index: {}]   ;;  %s1518_s2 = inlined_call_operand.hbm [shape: f32[8,128], index: 2, kind: input, shape index: {}]   ;;  %s1519_s3 = inlined_call_operand.hbm [shape: f32[8,384], index: 3, kind: output, shape index: {}]  }
   0x1   :  { %9 = vsyncpa [#allocation6], 0 }
   0x2   :  { %10 = vsyncpa [#allocation4], 0  ;;  %s1369_s12 = smov [#allocation5]   ;;  %s1275_s16 = scalar_lea.hbm %s1517_s1, 14336 }
   0x3   :  { %s26_s13 = sshll.u32 %s1369_s12, 4  ;;  %p1276_p0 = scmp.ne.s32.totalorder %s1517_s1, %s1275_s16  ;;  %s27_s13 = int_to_ptr.vmem [resolvable:$true] %s26_s13 }
   0x4   :  { %p1279_p1 = scmp.lt.u32.totalorder %s1275_s16, %s1517_s1 }
   0x6   :  { %p1281_p2 = pnand %p1279_p1, %p1276_p0 }
   0x8   :  { %1284 = shalt.err (!%p1281_p2)
}
   0x9   :  { %s1285_s21 = scalar_lea.vmem %s27_s13, 14336  ;;  %p1290_p4 = scmp.lt.s32.totalorder %s27_s13, %s27_s13 }
   0xa   :  { %p1286_p3 = scmp.ne.s32.totalorder %s27_s13, %s1285_s21  ;;  %p1291_p5 = scmp.lt.s32.totalorder %s1285_s21, %s1285_s21 }
   0xc   :  { %p1292_p6 = por %p1291_p5, %p1290_p4 }
   0xe   :  { %p1293_p7 = pnand %p1292_p6, %p1286_p3 }
  0x10   :  { %1296 = shalt.err (!%p1293_p7)
}
  0x11   :  { %s1370_s22 = smov 128   ;;  %s1371_s23 = smov 8  }
  0x12   :  { %32 = dma.hbm_to_vmem [thread:$0]  %s1517_s1, 14336, %s27_s13, [#allocation6], %s1370_s22, %s1370_s22, %s1371_s23  }
  0x13   :  { %s1372_s26 = smov [#allocation2]   ;;  %s1373_s28 = smov [#allocation7]  }
  0x14   :  { %s17_s27 = sshll.u32 %s1372_s26, 4  ;;  %s39_s29 = sshll.u32 %s1373_s28, 4  ;;  %s18_s27 = int_to_ptr.vmem [resolvable:$true] %s17_s27  ;;  %s40_s29 = int_to_ptr.vmem [resolvable:$true] %s39_s29 }
  0x15   :  { %s1297_s5 = scalar_lea.hbm %s1516_s0, 256 }
  0x16   :  { %p1298_p8 = scmp.ne.s32.totalorder %s1516_s0, %s1297_s5  ;;  %p1301_p9 = scmp.lt.u32.totalorder %s1297_s5, %s1516_s0 }
  0x18   :  { %p1303_p10 = pnand %p1301_p9, %p1298_p8 }
  0x1a   :  { %1306 = shalt.err (!%p1303_p10)
}
  0x1b   :  { %s1307_s1 = scalar_lea.vmem %s18_s27, 256  ;;  %p1312_p12 = scmp.lt.s32.totalorder %s18_s27, %s18_s27 }
  0x1c   :  { %p1308_p11 = scmp.ne.s32.totalorder %s18_s27, %s1307_s1  ;;  %p1313_p13 = scmp.lt.s32.totalorder %s1307_s1, %s1307_s1 }
  0x1e   :  { %p1314_p0 = por %p1313_p13, %p1312_p12 }
  0x20   :  { %p1315_p1 = pnand %p1314_p0, %p1308_p11 }
  0x22   :  { %1318 = shalt.err (!%p1315_p1)
}
  0x23   :  { %20 = dma.hbm_to_vmem [thread:$0]  %s1516_s0, 256, %s18_s27, [#allocation3]  }
  0x24   :  { %s1319_s14 = scalar_lea.hbm %s1518_s2, 128 }
  0x25   :  { %p1320_p2 = scmp.ne.s32.totalorder %s1518_s2, %s1319_s14  ;;  %p1323_p3 = scmp.lt.u32.totalorder %s1319_s14, %s1518_s2 }
  0x27   :  { %p1325_p4 = pnand %p1323_p3, %p1320_p2 }
  0x29   :  { %1328 = shalt.err (!%p1325_p4)
}
  0x2a   :  { %s1329_s19 = scalar_lea.vmem %s40_s29, 128  ;;  %p1334_p6 = scmp.lt.s32.totalorder %s40_s29, %s40_s29 }
  0x2b   :  { %p1330_p5 = scmp.ne.s32.totalorder %s40_s29, %s1329_s19  ;;  %p1335_p7 = scmp.lt.s32.totalorder %s1329_s19, %s1329_s19 }
  0x2d   :  { %p1336_p8 = por %p1335_p7, %p1334_p6 }
  0x2f   :  { %p1337_p9 = pnand %p1336_p8, %p1330_p5 }
  0x31   :  { %1340 = shalt.err (!%p1337_p9)
}
  0x32   :  { %42 = dma.hbm_to_vmem [thread:$0]  %s1518_s2, 128, %s40_s29, [#allocation6]  }
  0x33   :  { %1363 = dma.done.wait [#allocation3], 256  }
  0x34   :  { %1364 = vsyncadd [#allocation3], 4294967040 }
  0x35   :  { %1365 = dma.done.wait [#allocation6], 14464  }
  0x36   :  { %1366 = vsyncadd [#allocation6], 4294952832  ;;  %v1374_v0 = vmov 0.0|0.0   ;;  %vm1375_vm0 = vmmov 0   ;;  %v1376_v1 = vmov 0.0   ;;  %v54_v2 = vld [vmem:[#allocation5] sm:$0xff] }
  0x37   :  { %1096 = vmatprep.subr.bf16.mxu0 %v1374_v0  ;;  %883 = vmatprep.mubr.msk.f32.mxu0 %vm1375_vm0, %v1376_v1  ;;  %v55_v3 = vld [vmem:[#allocation5 + $0x8] sm:$0xff]  ;;  %v56_v4 = vld [vmem:[#allocation5 + $0x10] sm:$0xff]  ;;  %v57_v6 = vld [vmem:[#allocation5 + $0x18] sm:$0xff]  ;;  %s1377_s2 = smov [#allocation8]  }
  0x38   :  { %1120 = vmatprep.subr.bf16.mxu1 %v1374_v0  ;;  %918 = vmatprep.mubr.msk.f32.mxu1 %vm1375_vm0, %v1376_v1  ;;  %v1097_v5 = vpack.c.bf16 %v55_v3, %v54_v2  ;;  %v1100_v7 = vpack.c.bf16 %v57_v6, %v56_v4  ;;  %v58_v8 = vld [vmem:[#allocation5 + $0x20] sm:$0xff]  ;;  %v59_v9 = vld [vmem:[#allocation5 + $0x28] sm:$0xff]  ;;  %v149_v12 = vld [vmem:[#allocation5 + $0x90] sm:$0xff]  ;;  %s715_s21 = sshll.u32 %s1377_s2, 4  ;;  %s716_s21 = int_to_ptr.vmem [resolvable:$true] %s715_s21 }
  0x39   :  { %v147_v10 = vld [vmem:[#allocation5 + $0x80] sm:$0xff]  ;;  %v148_v11 = vld [vmem:[#allocation5 + $0x88] sm:$0xff]  ;;  %v150_v13 = vld [vmem:[#allocation5 + $0x98] sm:$0xff]  ;;  %v1103_v14 = vpack.c.bf16 %v59_v9, %v58_v8  ;;  %s1341_s22 = scalar_lea.vmem %s716_s21, 384  ;;  %p1346_p11 = scmp.lt.s32.totalorder %s716_s21, %s716_s21 }
  0x3a   :  { %1098 = vmatpush3.bf16.msra.mxu0 %v1097_v5  ;;  %v1121_v15 = vpack.c.bf16 %v148_v11, %v147_v10  ;;  %v60_v16 = vld [vmem:[#allocation5 + $0x30] sm:$0xff]  ;;  %v61_v17 = vld [vmem:[#allocation5 + $0x38] sm:$0xff]  ;;  %v1124_v18 = vpack.c.bf16 %v150_v13, %v149_v12  ;;  %v151_v19 = vld [vmem:[#allocation5 + $0xa0] sm:$0xff]  ;;  %p1342_p10 = scmp.ne.s32.totalorder %s716_s21, %s1341_s22  ;;  %p1347_p12 = scmp.lt.s32.totalorder %s1341_s22, %s1341_s22 }
  0x3b   :  { %1099 = vmatprep.subr.bf16.mxu0 %v1374_v0  ;;  %v152_v20 = vld [vmem:[#allocation5 + $0xa8] sm:$0xff]  ;;  %v1106_v21 = vpack.c.bf16 %v61_v17, %v60_v16  ;;  %v62_v22 = vld [vmem:[#allocation5 + $0x40] sm:$0xff]  ;;  %v153_v25 = vld [vmem:[#allocation5 + $0xb0] sm:$0xff] }
  0x3c   :  { %1122 = vmatpush3.bf16.msra.mxu1 %v1121_v15  ;;  %v63_v23 = vld [vmem:[#allocation5 + $0x48] sm:$0xff]  ;;  %v1127_v24 = vpack.c.bf16 %v152_v20, %v151_v19  ;;  %v154_v26 = vld [vmem:[#allocation5 + $0xb8] sm:$0xff]  ;;  %v64_v28 = vld [vmem:[#allocation5 + $0x50] sm:$0xff]  ;;  %p1348_p13 = por %p1347_p12, %p1346_p11 }
  0x3d   :  { %1123 = vmatprep.subr.bf16.mxu1 %v1374_v0  ;;  %v1109_v27 = vpack.c.bf16 %v63_v23, %v62_v22  ;;  %v65_v29 = vld [vmem:[#allocation5 + $0x58] sm:$0xff]  ;;  %v1130_v30 = vpack.c.bf16 %v154_v26, %v153_v25  ;;  %v155_v31 = vld [vmem:[#allocation5 + $0xc0] sm:$0xff]  ;;  %v156_v32 = vld [vmem:[#allocation5 + $0xc8] sm:$0xff] }
  0x3e   :  { %1101 = vmatpush3.bf16.msra.mxu0 %v1100_v7  ;;  %v1112_v33 = vpack.c.bf16 %v65_v29, %v64_v28  ;;  %v66_v34 = vld [vmem:[#allocation5 + $0x60] sm:$0xff]  ;;  %v67_v35 = vld [vmem:[#allocation5 + $0x68] sm:$0xff]  ;;  %v1133_v36 = vpack.c.bf16 %v156_v32, %v155_v31  ;;  %v157_v37 = vld [vmem:[#allocation5 + $0xd0] sm:$0xff]  ;;  %p1349_p0 = pnand %p1348_p13, %p1342_p10 }
  0x3f   :  { %1102 = vmatprep.subr.bf16.mxu0 %v1374_v0  ;;  %v158_v38 = vld [vmem:[#allocation5 + $0xd8] sm:$0xff]  ;;  %v1115_v39 = vpack.c.bf16 %v67_v35, %v66_v34  ;;  %v68_v40 = vld [vmem:[#allocation5 + $0x70] sm:$0xff]  ;;  %v159_v43 = vld [vmem:[#allocation5 + $0xe0] sm:$0xff] }
  0x40   :  { %1125 = vmatpush3.bf16.msra.mxu1 %v1124_v18  ;;  %v69_v41 = vld [vmem:[#allocation5 + $0x78] sm:$0xff]  ;;  %v1136_v42 = vpack.c.bf16 %v158_v38, %v157_v37  ;;  %v160_v44 = vld [vmem:[#allocation5 + $0xe8] sm:$0xff]  ;;  %v52_v47 = vld [vmem:[#allocation2] sm:$0xff] }
  0x41   :  { %1126 = vmatprep.subr.bf16.mxu1 %v1374_v0  ;;  %v1118_v45 = vpack.c.bf16 %v69_v41, %v68_v40  ;;  %v1139_v46 = vpack.c.bf16 %v160_v44, %v159_v43  ;;  %v161_v48 = vld [vmem:[#allocation5 + $0xf0] sm:$0xff]  ;;  %v162_v49 = vld [vmem:[#allocation5 + $0xf8] sm:$0xff]  ;;  %v240_v51 = vld [vmem:[#allocation5 + $0x100] sm:$0xff] }
  0x42   :  { %1104 = vmatpush3.bf16.msra.mxu0 %v1103_v14  ;;  %v1142_v50 = vpack.c.bf16 %v162_v49, %v161_v48  ;;  %v241_v52 = vld [vmem:[#allocation5 + $0x108] sm:$0xff]  ;;  %v242_v54 = vld [vmem:[#allocation5 + $0x110] sm:$0xff]  ;;  %v243_v55 = vld [vmem:[#allocation5 + $0x118] sm:$0xff] }
  0x43   :  { %1105 = vmatprep.subr.bf16.mxu0 %v1374_v0  ;;  %v1145_v53 = vpack.c.bf16 %v241_v52, %v240_v51  ;;  %v1148_v56 = vpack.c.bf16 %v243_v55, %v242_v54  ;;  %v244_v57 = vld [vmem:[#allocation5 + $0x120] sm:$0xff]  ;;  %v245_v58 = vld [vmem:[#allocation5 + $0x128] sm:$0xff]  ;;  %v246_v60 = vld [vmem:[#allocation5 + $0x130] sm:$0xff] }
  0x44   :  { %1128 = vmatpush3.bf16.msra.mxu1 %v1127_v24  ;;  %v1151_v59 = vpack.c.bf16 %v245_v58, %v244_v57  ;;  %v247_v61 = vld [vmem:[#allocation5 + $0x138] sm:$0xff]  ;;  %v248_v63 = vld [vmem:[#allocation5 + $0x140] sm:$0xff]  ;;  %v249_v2 = vld [vmem:[#allocation5 + $0x148] sm:$0xff] }
  0x45   :  { %1129 = vmatprep.subr.bf16.mxu1 %v1374_v0  ;;  %v1154_v62 = vpack.c.bf16 %v247_v61, %v246_v60  ;;  %v1157_v3 = vpack.c.bf16 %v249_v2, %v248_v63  ;;  %v250_v4 = vld [vmem:[#allocation5 + $0x150] sm:$0xff]  ;;  %v251_v5 = vld [vmem:[#allocation5 + $0x158] sm:$0xff]  ;;  %v252_v7 = vld [vmem:[#allocation5 + $0x160] sm:$0xff] }
  0x46   :  { %1107 = vmatpush3.bf16.msra.mxu0 %v1106_v21  ;;  %v1160_v6 = vpack.c.bf16 %v251_v5, %v250_v4  ;;  %v253_v8 = vld [vmem:[#allocation5 + $0x168] sm:$0xff]  ;;  %v725_v10 = vld [vmem:[#allocation7] ss:$0 sm:$0xff]  ;;  %v334_v18 = vld [vmem:[#allocation5 + $0x190] sm:$0xff] }
  0x47   :  { %1108 = vmatprep.subr.bf16.mxu0 %v1374_v0  ;;  %v1163_v9 = vpack.c.bf16 %v253_v8, %v252_v7  ;;  %v332_v11 = vld [vmem:[#allocation5 + $0x180] sm:$0xff]  ;;  %v333_v12 = vld [vmem:[#allocation5 + $0x188] sm:$0xff]  ;;  %v335_v19 = vld [vmem:[#allocation5 + $0x198] sm:$0xff] }
  0x48   :  { %1131 = vmatpush3.bf16.msra.mxu1 %v1130_v30  ;;  %v1169_v16 = vpack.c.bf16 %v333_v12, %v332_v11  ;;  %v1172_v20 = vpack.c.bf16 %v335_v19, %v334_v18  ;;  %v336_v21 = vld [vmem:[#allocation5 + $0x1a0] sm:$0xff]  ;;  %v337_v22 = vld [vmem:[#allocation5 + $0x1a8] sm:$0xff]  ;;  %v338_v24 = vld [vmem:[#allocation5 + $0x1b0] sm:$0xff] }
  0x49   :  { %1132 = vmatprep.subr.bf16.mxu1 %v1374_v0  ;;  %v1175_v23 = vpack.c.bf16 %v337_v22, %v336_v21  ;;  %v339_v25 = vld [vmem:[#allocation5 + $0x1b8] sm:$0xff]  ;;  %v341_v28 = vld [vmem:[#allocation5 + $0x1c8] sm:$0xff]  ;;  %v342_v30 = vld [vmem:[#allocation5 + $0x1d0] sm:$0xff] }
  0x4a   :  { %1110 = vmatpush3.bf16.msra.mxu0 %v1109_v27  ;;  %v1178_v26 = vpack.c.bf16 %v339_v25, %v338_v24  ;;  %v340_v27 = vld [vmem:[#allocation5 + $0x1c0] sm:$0xff]  ;;  %v343_v31 = vld [vmem:[#allocation5 + $0x1d8] sm:$0xff]  ;;  %v345_v34 = vld [vmem:[#allocation5 + $0x1e8] sm:$0xff] }
  0x4b   :  { %1111 = vmatprep.subr.bf16.mxu0 %v1374_v0  ;;  %v1181_v29 = vpack.c.bf16 %v341_v28, %v340_v27  ;;  %v1184_v32 = vpack.c.bf16 %v343_v31, %v342_v30  ;;  %v255_v37 = vld [vmem:[#allocation5 + $0x178] sm:$0xff]  ;;  %v346_v38 = vld [vmem:[#allocation5 + $0x1f0] sm:$0xff]  ;;  %v429_v43 = vld [vmem:[#allocation5 + $0x200] sm:$0xff] }
  0x4c   :  { %1134 = vmatpush3.bf16.msra.mxu1 %v1133_v36  ;;  %v254_v36 = vld [vmem:[#allocation5 + $0x170] sm:$0xff]  ;;  %v347_v40 = vld [vmem:[#allocation5 + $0x1f8] sm:$0xff]  ;;  %v430_v44 = vld [vmem:[#allocation5 + $0x208] sm:$0xff] }
  0x4d   :  { %1135 = vmatprep.subr.bf16.mxu1 %v1374_v0  ;;  %v1190_v41 = vpack.c.bf16 %v347_v40, %v346_v38  ;;  %v1193_v48 = vpack.c.bf16 %v430_v44, %v429_v43  ;;  %v432_v51 = vld [vmem:[#allocation5 + $0x218] sm:$0xff]  ;;  %v434_v54 = vld [vmem:[#allocation5 + $0x228] sm:$0xff]  ;;  %v524_v11 = vld [vmem:[#allocation5 + $0x290] sm:$0xff] }
  0x4e   :  { %1113 = vmatpush3.bf16.msra.mxu0 %v1112_v33  ;;  %v344_v33 = vld [vmem:[#allocation5 + $0x1e0] sm:$0xff]  ;;  %v436_v57 = vld [vmem:[#allocation5 + $0x238] sm:$0xff]  ;;  %v438_v60 = vld [vmem:[#allocation5 + $0x248] sm:$0xff] }
  0x4f   :  { %1114 = vmatprep.subr.bf16.mxu0 %v1374_v0  ;;  %v1187_v35 = vpack.c.bf16 %v345_v34, %v344_v33  ;;  %v440_v63 = vld [vmem:[#allocation5 + $0x258] sm:$0xff]  ;;  %v442_v4 = vld [vmem:[#allocation5 + $0x268] sm:$0xff]  ;;  %v528_v18 = vld [vmem:[#allocation5 + $0x2b0] sm:$0xff] }
  0x50   :  { %1137 = vmatpush3.bf16.msra.mxu1 %v1136_v42  ;;  %v726_v42 = vld [vmem:[#allocation7 + $0x1] ss:$0 sm:$0xff]  ;;  %v444_v7 = vld [vmem:[#allocation5 + $0x278] sm:$0xff]  ;;  %v531_v22 = vld [vmem:[#allocation5 + $0x2c8] sm:$0xff] }
  0x51   :  { %1138 = vmatprep.subr.bf16.mxu1 %v1374_v0  ;;  %v529_v19 = vld [vmem:[#allocation5 + $0x2b8] sm:$0xff]  ;;  %v530_v21 = vld [vmem:[#allocation5 + $0x2c0] sm:$0xff]  ;;  %v532_v24 = vld [vmem:[#allocation5 + $0x2d0] sm:$0xff] }
  0x52   :  { %1116 = vmatpush3.bf16.msra.mxu0 %v1115_v39  ;;  %v1166_v39 = vpack.c.bf16 %v255_v37, %v254_v36  ;;  %v533_v25 = vld [vmem:[#allocation5 + $0x2d8] sm:$0xff]  ;;  %v534_v27 = vld [vmem:[#allocation5 + $0x2e0] sm:$0xff]  ;;  %v535_v28 = vld [vmem:[#allocation5 + $0x2e8] sm:$0xff] }
  0x53   :  { %1117 = vmatprep.subr.bf16.mxu0 %v1374_v0  ;;  %v727_v30 = vld [vmem:[#allocation7 + $0x2] ss:$0 sm:$0xff]  ;;  %v728_v31 = vld [vmem:[#allocation7 + $0x3] ss:$0 sm:$0xff]  ;;  %v53_v40 = vld [vmem:[#allocation2 + $0x8] sm:$0xff] }
  0x54   :  { %1140 = vmatpush3.bf16.msra.mxu1 %v1139_v46  ;;  %v536_v44 = vld [vmem:[#allocation5 + $0x2f0] sm:$0xff] }
  0x55   :  { %1141 = vmatprep.subr.bf16.mxu1 %v1374_v0 }
  0x56   :  { %1119 = vmatpush3.bf16.msra.mxu0 %v1118_v45 }
  0x57   :  { %1144 = vmatprep.subr.bf16.mxu0 %v1374_v0 }
  0x58   :  { %1143 = vmatpush3.bf16.msra.mxu1 %v1142_v50  ;;  %v431_v50 = vld [vmem:[#allocation5 + $0x210] sm:$0xff] }
  0x59   :  { %884 = vmatmul.mubr.f32.vlgmr.msra.gmra.mrb[0].mxu0 %v52_v47  ;;  %1168 = vmatprep.subr.bf16.mxu1 %v1374_v0  ;;  %v1196_v52 = vpack.c.bf16 %v432_v51, %v431_v50  ;;  %v618_v51 = vld [vmem:[#allocation5 + $0x318] sm:$0xff] }
  0x5a   :  { %953 = vmatprep.mubr.msk.f32.mxu0 %vm1375_vm0, %v1376_v1  ;;  %1146 = vmatpush3.bf16.msra.mxu0 %v1145_v53  ;;  %v433_v53 = vld [vmem:[#allocation5 + $0x220] sm:$0xff] }
  0x5b   :  { %1147 = vmatprep.subr.bf16.mxu0 %v1374_v0  ;;  %v1199_v55 = vpack.c.bf16 %v434_v54, %v433_v53  ;;  %v619_v53 = vld [vmem:[#allocation5 + $0x320] sm:$0xff]  ;;  %v620_v54 = vld [vmem:[#allocation5 + $0x328] sm:$0xff] }
  0x5e   :  { %1149 = vmatpush3.bf16.msra.mxu0 %v1148_v56  ;;  %v435_v56 = vld [vmem:[#allocation5 + $0x230] sm:$0xff] }
  0x5f   :  { %1150 = vmatprep.subr.bf16.mxu0 %v1374_v0  ;;  %v1202_v58 = vpack.c.bf16 %v436_v57, %v435_v56  ;;  %v622_v56 = vld [vmem:[#allocation5 + $0x338] sm:$0xff] }
  0x62   :  { %1152 = vmatpush3.bf16.msra.mxu0 %v1151_v59  ;;  %v437_v59 = vld [vmem:[#allocation5 + $0x240] sm:$0xff] }
  0x63   :  { %1153 = vmatprep.subr.bf16.mxu0 %v1374_v0  ;;  %v1205_v61 = vpack.c.bf16 %v438_v60, %v437_v59  ;;  %v624_v59 = vld [vmem:[#allocation5 + $0x348] sm:$0xff] }
  0x66   :  { %1155 = vmatpush3.bf16.msra.mxu0 %v1154_v62  ;;  %v439_v62 = vld [vmem:[#allocation5 + $0x250] sm:$0xff] }
  0x67   :  { %1156 = vmatprep.subr.bf16.mxu0 %v1374_v0  ;;  %v1208_v2 = vpack.c.bf16 %v440_v63, %v439_v62  ;;  %v626_v62 = vld [vmem:[#allocation5 + $0x358] sm:$0xff] }
  0x6a   :  { %1158 = vmatpush3.bf16.msra.mxu0 %v1157_v3  ;;  %v441_v3 = vld [vmem:[#allocation5 + $0x260] sm:$0xff] }
  0x6b   :  { %1159 = vmatprep.subr.bf16.mxu0 %v1374_v0  ;;  %v1211_v5 = vpack.c.bf16 %v442_v4, %v441_v3  ;;  %v628_v3 = vld [vmem:[#allocation5 + $0x368] sm:$0xff] }
  0x6e   :  { %1161 = vmatpush3.bf16.msra.mxu0 %v1160_v6  ;;  %v443_v6 = vld [vmem:[#allocation5 + $0x270] sm:$0xff] }
  0x6f   :  { %1162 = vmatprep.subr.bf16.mxu0 %v1374_v0  ;;  %v1214_v8 = vpack.c.bf16 %v444_v7, %v443_v6 }
  0x72   :  { %1164 = vmatpush3.bf16.msra.mxu0 %v1163_v9  ;;  %v522_v9 = vld [vmem:[#allocation5 + $0x280] sm:$0xff] }
  0x73   :  { %1165 = vmatprep.subr.bf16.mxu0 %v1374_v0 }
  0x76   :  { %1167 = vmatpush3.bf16.msra.mxu0 %v1166_v39 }
  0x77   :  { %1192 = vmatprep.subr.bf16.mxu0 %v1374_v0 }
 0x12c   :  { %v141_v13 = vpop.f32.mrb[0].mxu0 }
 0x12d   :  { %v142_v14 = vadd.f32 %v725_v10, %v141_v13  ;;  %v885_v15 = vpop.f32.mrb[1].mxu0  ;;  %v523_v10 = vld [vmem:[#allocation5 + $0x288] sm:$0xff]  ;;  %v525_v13 = vld [vmem:[#allocation5 + $0x298] sm:$0xff] }
 0x12e   :  { %v1217_v12 = vpack.c.bf16 %v523_v10, %v522_v9  ;;  %v526_v15 = vld [vmem:[#allocation5 + $0x2a0] sm:$0xff]  ;;  %v629_v10 = vld [vmem:[#allocation5 + $0x370] sm:$0xff] }
 0x12f   :  { %v145_v17 = vmax.f32 %v142_v14, 0.0  ;;  %v1220_v14 = vpack.c.bf16 %v525_v13, %v524_v11  ;;  %v630_v11 = vld [vmem:[#allocation5 + $0x378] sm:$0xff]  ;;  %v730_v13 = vld [vmem:[#allocation7 + $0x5] ss:$0 sm:$0xff] }
 0x131   :  { %919 = vmatmul.mubr.f32.vlgmr.msra.gmra.mrb[0].mxu1 %v145_v17 }
 0x132   :  { %1170 = vmatpush3.bf16.msra.mxu1 %v1169_v16  ;;  %988 = vmatprep.mubr.msk.f32.mxu1 %vm1375_vm0, %v1376_v1  ;;  %v527_v16 = vld [vmem:[#allocation5 + $0x2a8] sm:$0xff] }
 0x133   :  { %1171 = vmatprep.subr.bf16.mxu1 %v1374_v0  ;;  %v1223_v17 = vpack.c.bf16 %v527_v16, %v526_v15 }
 0x136   :  { %1173 = vmatpush3.bf16.msra.mxu1 %v1172_v20  ;;  %v1226_v20 = vpack.c.bf16 %v529_v19, %v528_v18  ;;  %v731_v18 = vld [vmem:[#allocation7 + $0x6] ss:$0 sm:$0xff] }
 0x137   :  { %1174 = vmatprep.subr.bf16.mxu1 %v1374_v0 }
 0x13a   :  { %1176 = vmatpush3.bf16.msra.mxu1 %v1175_v23  ;;  %v1229_v23 = vpack.c.bf16 %v531_v22, %v530_v21 }
 0x13b   :  { %1177 = vmatprep.subr.bf16.mxu1 %v1374_v0 }
 0x13e   :  { %1179 = vmatpush3.bf16.msra.mxu1 %v1178_v26  ;;  %v1232_v26 = vpack.c.bf16 %v533_v25, %v532_v24 }
 0x13f   :  { %1180 = vmatprep.subr.bf16.mxu1 %v1374_v0 }
 0x142   :  { %1182 = vmatpush3.bf16.msra.mxu1 %v1181_v29  ;;  %v1235_v29 = vpack.c.bf16 %v535_v28, %v534_v27 }
 0x143   :  { %1183 = vmatprep.subr.bf16.mxu1 %v1374_v0 }
 0x146   :  { %1185 = vmatpush3.bf16.msra.mxu1 %v1184_v32 }
 0x147   :  { %1186 = vmatprep.subr.bf16.mxu1 %v1374_v0 }
 0x14a   :  { %1188 = vmatpush3.bf16.msra.mxu1 %v1187_v35 }
 0x14b   :  { %1189 = vmatprep.subr.bf16.mxu1 %v1374_v0 }
 0x14e   :  { %1191 = vmatpush3.bf16.msra.mxu1 %v1190_v41 }
 0x14f   :  { %1216 = vmatprep.subr.bf16.mxu1 %v1374_v0 }
 0x204   :  { %v234_v45 = vpop.f32.mrb[0].mxu1 }
 0x205   :  { %v235_v46 = vadd.f32 %v726_v42, %v234_v45  ;;  %v920_v47 = vpop.f32.mrb[1].mxu1  ;;  %v537_v45 = vld [vmem:[#allocation5 + $0x2f8] sm:$0xff] }
 0x206   :  { %v615_v47 = vld [vmem:[#allocation5 + $0x300] sm:$0xff] }
 0x207   :  { %v238_v49 = vmax.f32 %v235_v46, 0.0  ;;  %v1238_v46 = vpack.c.bf16 %v537_v45, %v536_v44 }
 0x209   :  { %954 = vmatmul.mubr.f32.vlgmr.msra.gmra.mrb[2].mxu0 %v238_v49  ;;  %989 = vmatmul.mubr.f32.vlgmr.msra.gmra.mrb[2].mxu1 %v238_v49  ;;  %v617_v49 = vld [vmem:[#allocation5 + $0x310] sm:$0xff] }
 0x20a   :  { %1194 = vmatpush3.bf16.msra.mxu0 %v1193_v48  ;;  %1023 = vmatprep.mubr.msk.f32.mxu0 %vm1375_vm0, %v1376_v1  ;;  %v616_v48 = vld [vmem:[#allocation5 + $0x308] sm:$0xff] }
 0x20b   :  { %1195 = vmatprep.subr.bf16.mxu0 %v1374_v0  ;;  %1058 = vmatprep.mubr.msk.f32.mxu1 %vm1375_vm0, %v1376_v1  ;;  %v1241_v50 = vpack.c.bf16 %v616_v48, %v615_v47 }
 0x20c   :  { %1218 = vmatpush3.bf16.msra.mxu1 %v1217_v12  ;;  %v1262_v12 = vpack.c.bf16 %v630_v11, %v629_v10 }
 0x20d   :  { %1219 = vmatprep.subr.bf16.mxu1 %v1374_v0 }
 0x20e   :  { %1197 = vmatpush3.bf16.msra.mxu0 %v1196_v52  ;;  %v1244_v52 = vpack.c.bf16 %v618_v51, %v617_v49 }
 0x20f   :  { %1198 = vmatprep.subr.bf16.mxu0 %v1374_v0 }
 0x210   :  { %1221 = vmatpush3.bf16.msra.mxu1 %v1220_v14 }
 0x211   :  { %1222 = vmatprep.subr.bf16.mxu1 %v1374_v0 }
 0x212   :  { %1200 = vmatpush3.bf16.msra.mxu0 %v1199_v55  ;;  %v1247_v55 = vpack.c.bf16 %v620_v54, %v619_v53 }
 0x213   :  { %1201 = vmatprep.subr.bf16.mxu0 %v1374_v0 }
 0x214   :  { %1224 = vmatpush3.bf16.msra.mxu1 %v1223_v17 }
 0x215   :  { %1225 = vmatprep.subr.bf16.mxu1 %v1374_v0 }
 0x216   :  { %1203 = vmatpush3.bf16.msra.mxu0 %v1202_v58  ;;  %v623_v58 = vld [vmem:[#allocation5 + $0x340] sm:$0xff] }
 0x217   :  { %1204 = vmatprep.subr.bf16.mxu0 %v1374_v0  ;;  %v1253_v60 = vpack.c.bf16 %v624_v59, %v623_v58 }
 0x218   :  { %1227 = vmatpush3.bf16.msra.mxu1 %v1226_v20 }
 0x219   :  { %1228 = vmatprep.subr.bf16.mxu1 %v1374_v0 }
 0x21a   :  { %1206 = vmatpush3.bf16.msra.mxu0 %v1205_v61  ;;  %v625_v61 = vld [vmem:[#allocation5 + $0x350] sm:$0xff] }
 0x21b   :  { %1207 = vmatprep.subr.bf16.mxu0 %v1374_v0  ;;  %v1256_v63 = vpack.c.bf16 %v626_v62, %v625_v61 }
 0x21c   :  { %1230 = vmatpush3.bf16.msra.mxu1 %v1229_v23 }
 0x21d   :  { %1231 = vmatprep.subr.bf16.mxu1 %v1374_v0 }
 0x21e   :  { %1209 = vmatpush3.bf16.msra.mxu0 %v1208_v2  ;;  %v627_v2 = vld [vmem:[#allocation5 + $0x360] sm:$0xff] }
 0x21f   :  { %1210 = vmatprep.subr.bf16.mxu0 %v1374_v0  ;;  %v1259_v4 = vpack.c.bf16 %v628_v3, %v627_v2 }
 0x220   :  { %1233 = vmatpush3.bf16.msra.mxu1 %v1232_v26 }
 0x221   :  { %1234 = vmatprep.subr.bf16.mxu1 %v1374_v0 }
 0x222   :  { %1212 = vmatpush3.bf16.msra.mxu0 %v1211_v5  ;;  %v729_v5 = vld [vmem:[#allocation7 + $0x4] ss:$0 sm:$0xff] }
 0x223   :  { %1213 = vmatprep.subr.bf16.mxu0 %v1374_v0 }
 0x224   :  { %1236 = vmatpush3.bf16.msra.mxu1 %v1235_v29 }
 0x225   :  { %1237 = vmatprep.subr.bf16.mxu1 %v1374_v0 }
 0x226   :  { %1215 = vmatpush3.bf16.msra.mxu0 %v1214_v8 }
 0x227   :  { %1240 = vmatprep.subr.bf16.mxu0 %v1374_v0 }
 0x228   :  { %1239 = vmatpush3.bf16.msra.mxu1 %v1238_v46 }
 0x2dc   :  { %v327_v32 = vpop.f32.mrb[2].mxu0  ;;  %v419_v33 = vpop.f32.mrb[2].mxu1 }
 0x2dd   :  { %v328_v34 = vadd.f32 %v727_v30, %v327_v32  ;;  %v420_v35 = vadd.f32 %v728_v31, %v419_v33  ;;  %v955_v36 = vpop.f32.mrb[3].mxu0  ;;  %v990_v37 = vpop.f32.mrb[3].mxu1 }
 0x2df   :  { %707 = vst [vmem:[#allocation8 + $0x8] sm:$0xff] %v328_v34  ;;  %v423_v38 = vmul.f32 0.5, %v420_v35  ;;  %708 = vst [vmem:[#allocation8 + $0x10] sm:$0xff] %v420_v35 }
 0x2e1   :  { %v424_v39 = vmul.f32 1.442695, %v423_v38 }
 0x2e3   :  { %1273 = vpow2.f32 %v424_v39 }
 0x2ed   :  { %v1274_v41 = vpop.eup %1273 }
 0x2ee   :  { %v426_v42 = vmul.f32 %v1274_v41, %v53_v40 }
 0x2f0   :  { %v427_v43 = vadd.f32 %v426_v42, %v328_v34 }
 0x2f2   :  { %1024 = vmatmul.mubr.f32.vlgmr.msra.gmra.mrb[4].mxu0 %v427_v43 }
 0x2f3   :  { %1093 = vmatprep.mubr.msk.f32.mxu0 %vm1375_vm0, %v1376_v1  ;;  %1242 = vmatpush3.bf16.msra.mxu0 %v1241_v50  ;;  %v621_v1 = vld [vmem:[#allocation5 + $0x330] sm:$0xff] }
 0x2f4   :  { %1243 = vmatprep.subr.bf16.mxu0 %v1374_v0  ;;  %v1250_v57 = vpack.c.bf16 %v622_v56, %v621_v1 }
 0x2f7   :  { %1245 = vmatpush3.bf16.msra.mxu0 %v1244_v52 }
 0x2f8   :  { %1246 = vmatprep.subr.bf16.mxu0 %v1374_v0 }
 0x2fb   :  { %1248 = vmatpush3.bf16.msra.mxu0 %v1247_v55 }
 0x2fc   :  { %1249 = vmatprep.subr.bf16.mxu0 %v1374_v0 }
 0x2ff   :  { %1251 = vmatpush3.bf16.msra.mxu0 %v1250_v57 }
 0x300   :  { %1252 = vmatprep.subr.bf16.mxu0 %v1374_v0 }
 0x303   :  { %1254 = vmatpush3.bf16.msra.mxu0 %v1253_v60 }
 0x304   :  { %1255 = vmatprep.subr.bf16.mxu0 %v1374_v0 }
 0x307   :  { %1257 = vmatpush3.bf16.msra.mxu0 %v1256_v63 }
 0x308   :  { %1258 = vmatprep.subr.bf16.mxu0 %v1374_v0 }
 0x30b   :  { %1260 = vmatpush3.bf16.msra.mxu0 %v1259_v4 }
 0x30c   :  { %1261 = vmatprep.subr.bf16.mxu0 %v1374_v0 }
 0x30f   :  { %1263 = vmatpush3.bf16.msra.mxu0 %v1262_v12 }
 0x3c5   :  { %v516_v6 = vpop.f32.mrb[4].mxu0 }
 0x3c6   :  { %v517_v7 = vadd.f32 %v729_v5, %v516_v6  ;;  %v1025_v8 = vpop.f32.mrb[5].mxu0 }
 0x3c8   :  { %v520_v9 = vmax.f32 %v517_v7, 0.0 }
 0x3ca   :  { %1059 = vmatmul.mubr.f32.vlgmr.msra.gmra.mrb[4].mxu1 %v520_v9 }
 0x49d   :  { %v609_v14 = vpop.f32.mrb[4].mxu1 }
 0x49e   :  { %v610_v15 = vadd.f32 %v730_v13, %v609_v14  ;;  %v1060_v16 = vpop.f32.mrb[5].mxu1 }
 0x4a0   :  { %v613_v17 = vmax.f32 %v610_v15, 0.0 }
 0x4a2   :  { %1094 = vmatmul.mubr.f32.vlgmr.msra.gmra.mrb[6].mxu0 %v613_v17 }
 0x575   :  { %v702_v0 = vpop.f32.mrb[6].mxu0 }
 0x576   :  { %v703_v19 = vadd.f32 %v731_v18, %v702_v0  ;;  %v1095_v20 = vpop.f32.mrb[7].mxu0 }
 0x578   :  { %706 = vst [vmem:[#allocation8] sm:$0xff] %v703_v19 }
 0x579   :  { %1352 = shalt.err (!%p1349_p0)
}
 0x57a   :  { %s1353_s25 = scalar_lea.hbm %s1519_s3, 384 }
 0x57b   :  { %p1354_p1 = scmp.ne.s32.totalorder %s1519_s3, %s1353_s25  ;;  %p1357_p2 = scmp.lt.u32.totalorder %s1353_s25, %s1519_s3 }
 0x57d   :  { %p1359_p3 = pnand %p1357_p2, %p1354_p1 }
 0x57f   :  { %1362 = shalt.err (!%p1359_p3)
}
 0x580   :  { %718 = dma.vmem_to_hbm [thread:$0]  %s716_s21, 384, %s1519_s3, [#allocation4]  }
 0x581   :  { %1367 = dma.done.wait [#allocation4], 384  }
 0x582   :  { %1368 = vsyncadd [#allocation4], 4294966912 }
 0x583   :  { %722 = vsyncpa [#allocation3], 1 }
 0x584   :  { %723 = vsyncpa [#allocation6], 1 }
 0x585   :  { %724 = vsyncpa [#allocation4], 1 }

</bundles_post_ra>
